<compile_context>
chip_gen: v7x
topology: tpu7x:2x2x1
jax: 0.10.0
libtpu: 0.0.40
codegen_flags: <defaults>
</compile_context>

<pallas_src>
import jax
import jax.numpy as jnp
from jax.experimental import pallas as pl
from jax.experimental.pallas import tpu as pltpu


def _round_up(x, m):
    return (x + m - 1) // m * m


def lstm_cell_kernel(x_ref, h_ref, c_ref, wi_ref, wh_ref, b_ref,
                     h_out_ref, c_out_ref):
    Hp = h_ref.shape[1]                       # per-gate (lane-dense) width

    # bf16 operands (pre-cast in the wrapper), f32 accumulation on the MXU.
    gates = (jnp.dot(x_ref[...], wi_ref[...], preferred_element_type=jnp.float32)
             + jnp.dot(h_ref[...], wh_ref[...], preferred_element_type=jnp.float32)
             + b_ref[...])                    # (TB, 4*Hp) f32

    def sigmoid(z):
        # sigmoid(z) = 0.5 * (1 + tanh(z/2)) -> single EUP op per gate.
        return 0.5 * (jnp.tanh(0.5 * z) + 1.0)

    # Static, 128-lane-aligned slices of the fused gate block.
    i_g = sigmoid(gates[:, 0 * Hp:1 * Hp])
    f_g = sigmoid(gates[:, 1 * Hp:2 * Hp])
    g_g = jnp.tanh(gates[:, 2 * Hp:3 * Hp])
    o_g = sigmoid(gates[:, 3 * Hp:4 * Hp])

    c_new = f_g * c_ref[...] + i_g * g_g      # f32 state update
    h_out_ref[...] = o_g * jnp.tanh(c_new)
    c_out_ref[...] = c_new


def my_lstm_cell_forward(x, h_prev, c_prev, w_i, b_i, w_h, b_h):
    """x:(B,I) f32; h_prev,c_prev:(B,H); w_i:(I,4H); w_h:(H,4H); b_*:(4H,)."""
    B, I = x.shape
    H = h_prev.shape[1]
    LANE, SUB = 128, 8

    Hp = _round_up(H, LANE)                   # per-gate lane-dense width
    Ip = _round_up(I, LANE)                   # lane-aligned input width
    TB = 128 if B >= 128 else _round_up(B, SUB)
    Bp = _round_up(B, TB)
    grid = (Bp // TB,)

    # Pad each of the 4 gate blocks of the (in, 4H) weight out to Hp columns so
    # the in-kernel gate chunking stays aligned to 128-lane boundaries.  Padded
    # columns / rows are pure zeros -> padded h/c lanes stay inert and are
    # sliced off at the end.
    def pad_gate_cols(w):
        d_in = w.shape[0]
        w4 = w.reshape(d_in, 4, H)
        w4 = jnp.pad(w4, ((0, 0), (0, 0), (0, Hp - H)))
        return w4.reshape(d_in, 4 * Hp)

    def pad_gate_bias(b):
        b4 = b.reshape(1, 4, H)
        b4 = jnp.pad(b4, ((0, 0), (0, 0), (0, Hp - H)))
        return b4.reshape(1, 4 * Hp)

    # Weights: pad + cast to bf16 once in the wrapper (half the resident DMA).
    wi_p = jnp.pad(pad_gate_cols(w_i), ((0, Ip - I), (0, 0))).astype(jnp.bfloat16)
    wh_p = jnp.pad(pad_gate_cols(w_h), ((0, Hp - H), (0, 0))).astype(jnp.bfloat16)
    # Biases are only ever used summed -> fuse host-side, keep f32.
    b_p = pad_gate_bias(b_i) + pad_gate_bias(b_h)              # (1, 4*Hp) f32

    # Activations: bf16 matmul operands; cell state stays f32 for precision.
    x_p = jnp.pad(x, ((0, Bp - B), (0, Ip - I))).astype(jnp.bfloat16)
    h_p = jnp.pad(h_prev, ((0, Bp - B), (0, Hp - H))).astype(jnp.bfloat16)
    c_p = jnp.pad(c_prev, ((0, Bp - B), (0, Hp - H)))          # (Bp, Hp) f32

    batch_spec_x = pl.BlockSpec((TB, Ip), lambda b: (b, 0))
    batch_spec_h = pl.BlockSpec((TB, Hp), lambda b: (b, 0))

    def resident(shape):                      # VMEM-resident across all tiles
        return pl.BlockSpec(shape, lambda b: (0, 0))

    h_out, c_out = pl.pallas_call(
        lstm_cell_kernel,
        out_shape=(jax.ShapeDtypeStruct((Bp, Hp), jnp.float32),
                   jax.ShapeDtypeStruct((Bp, Hp), jnp.float32)),
        grid=grid,
        in_specs=[batch_spec_x, batch_spec_h, batch_spec_h,
                  resident(wi_p.shape), resident(wh_p.shape),
                  resident(b_p.shape)],
        out_specs=(batch_spec_h, batch_spec_h),
        compiler_params=pltpu.CompilerParams(
            dimension_semantics=("parallel",),
            vmem_limit_bytes=100 << 20),
    )(x_p, h_p, c_p, wi_p, wh_p, b_p)

    return h_out[:B, :H], c_out[:B, :H]


def reference_forward(x, h_prev, c_prev, w_i, b_i, w_h, b_h):
    gates = x @ w_i + b_i + h_prev @ w_h + b_h
    i, f, g, o = jnp.split(gates, 4, axis=-1)
    i = jax.nn.sigmoid(i)
    f = jax.nn.sigmoid(f)
    g = jnp.tanh(g)
    o = jax.nn.sigmoid(o)
    c = f * c_prev + i * g
    h = o * jnp.tanh(c)
    return h, c


if __name__ == "__main__":
    # Small deterministic shapes consistent with MyLSTMCell.
    B = 2          # batch
    I = 32         # input_size
    H = 32         # hidden_size

    key = jax.random.PRNGKey(0)
    k_x, k_h, k_c, k_wi, k_bi, k_wh, k_bh = jax.random.split(key, 7)

    stdv = 1.0 / (H ** 0.5)        # PyTorch's reset_parameters() init range
    x = jax.random.normal(k_x, (B, I), dtype=jnp.float32)
    h_prev = jax.random.normal(k_h, (B, H), dtype=jnp.float32) * 0.5
    c_prev = jax.random.normal(k_c, (B, H), dtype=jnp.float32) * 0.5
    # Weights stored as (in, out) == PyTorch Linear weight transposed.
    w_i = jax.random.uniform(k_wi, (I, 4 * H), jnp.float32, -stdv, stdv)
    b_i = jax.random.uniform(k_bi, (4 * H,), jnp.float32, -stdv, stdv)
    w_h = jax.random.uniform(k_wh, (H, 4 * H), jnp.float32, -stdv, stdv)
    b_h = jax.random.uniform(k_bh, (4 * H,), jnp.float32, -stdv, stdv)

    h_new, c_new = my_lstm_cell_forward(x, h_prev, c_prev, w_i, b_i, w_h, b_h)
    h_new = jax.block_until_ready(h_new)
    c_new = jax.block_until_ready(c_new)

    h_ref, c_ref = reference_forward(x, h_prev, c_prev, w_i, b_i, w_h, b_h)
    assert h_new.shape == (B, H) and c_new.shape == (B, H)
    # bf16 matmul operands -> relaxed tolerance vs. the f32 reference.
    assert jnp.allclose(h_new, h_ref, atol=2e-2, rtol=2e-2), (h_new, h_ref)
    assert jnp.allclose(c_new, c_ref, atol=2e-2, rtol=2e-2), (c_new, c_ref)
    print("KERNEL_OK")
</pallas_src>

<mosaic_0001>
module attributes {stable_mosaic.version = 11 : i64} {
  func.func @lstm_cell_kernel(%arg0: i32, %arg1: memref<8x128xbf16, #tpu.memory_space<vmem>>, %arg2: memref<8x128xbf16, #tpu.memory_space<vmem>>, %arg3: memref<8x128xf32, #tpu.memory_space<vmem>>, %arg4: memref<128x512xbf16, #tpu.memory_space<vmem>>, %arg5: memref<128x512xbf16, #tpu.memory_space<vmem>>, %arg6: memref<1x512xf32, #tpu.memory_space<vmem>>, %arg7: memref<8x128xf32, #tpu.memory_space<vmem>>, %arg8: memref<8x128xf32, #tpu.memory_space<vmem>>) attributes {dimension_semantics = [#tpu.dimension_semantics<parallel>], iteration_bounds = array<i64: 1>, scalar_prefetch = 0 : i64, scratch_operands = 0 : i64, tpu.core_type = #tpu.core_type<tc>, window_params = [{transform_indices = @transform_0, window_bounds = array<i64: 8, 128>}, {transform_indices = @transform_1, window_bounds = array<i64: 8, 128>}, {transform_indices = @transform_2, window_bounds = array<i64: 8, 128>}, {pipeline_mode = #tpu.pipeline_mode<synchronous>, transform_indices = @transform_3, window_bounds = array<i64: 128, 512>}, {pipeline_mode = #tpu.pipeline_mode<synchronous>, transform_indices = @transform_4, window_bounds = array<i64: 128, 512>}, {pipeline_mode = #tpu.pipeline_mode<synchronous>, transform_indices = @transform_5, window_bounds = array<i64: 1, 512>}, {transform_indices = @transform_6, window_bounds = array<i64: 8, 128>}, {transform_indices = @transform_7, window_bounds = array<i64: 8, 128>}]} {
    %c0 = arith.constant 0 : index
    %c0_0 = arith.constant 0 : index
    %0 = vector.load %arg1[%c0, %c0_0] : memref<8x128xbf16, #tpu.memory_space<vmem>>, vector<8x128xbf16>
    %c0_1 = arith.constant 0 : index
    %c0_2 = arith.constant 0 : index
    %1 = vector.load %arg4[%c0_1, %c0_2] : memref<128x512xbf16, #tpu.memory_space<vmem>>, vector<128x512xbf16>
    %cst = arith.constant dense<0.000000e+00> : vector<8x512xf32>
    %2 = tpu.matmul %0, %1, %cst {dimension_numbers = #tpu.dot_dimension_numbers<[1], [0], [0], [1], [0, 0, 1, 1], [], []>} : vector<8x128xbf16>, vector<128x512xbf16>, vector<8x512xf32> -> vector<8x512xf32>
    %c0_3 = arith.constant 0 : index
    %c0_4 = arith.constant 0 : index
    %3 = vector.load %arg2[%c0_3, %c0_4] : memref<8x128xbf16, #tpu.memory_space<vmem>>, vector<8x128xbf16>
    %c0_5 = arith.constant 0 : index
    %c0_6 = arith.constant 0 : index
    %4 = vector.load %arg5[%c0_5, %c0_6] : memref<128x512xbf16, #tpu.memory_space<vmem>>, vector<128x512xbf16>
    %cst_7 = arith.constant dense<0.000000e+00> : vector<8x512xf32>
    %5 = tpu.matmul %3, %4, %cst_7 {dimension_numbers = #tpu.dot_dimension_numbers<[1], [0], [0], [1], [0, 0, 1, 1], [], []>} : vector<8x128xbf16>, vector<128x512xbf16>, vector<8x512xf32> -> vector<8x512xf32>
    %6 = arith.addf %2, %5 : vector<8x512xf32>
    %c0_8 = arith.constant 0 : index
    %c0_9 = arith.constant 0 : index
    %7 = vector.load %arg6[%c0_8, %c0_9] : memref<1x512xf32, #tpu.memory_space<vmem>>, vector<1x512xf32>
    %8 = vector.broadcast %7 : vector<1x512xf32> to vector<8x512xf32>
    %9 = arith.addf %6, %8 : vector<8x512xf32>
    %10 = vector.extract_strided_slice %9 {offsets = [0, 0], sizes = [8, 128], strides = [1, 1]} : vector<8x512xf32> to vector<8x128xf32>
    %cst_10 = arith.constant 5.000000e-01 : f32
    %11 = vector.broadcast %cst_10 : f32 to vector<8x128xf32>
    %12 = arith.mulf %11, %10 : vector<8x128xf32>
    %13 = math.tanh %12 : vector<8x128xf32>
    %cst_11 = arith.constant 1.000000e+00 : f32
    %14 = vector.broadcast %cst_11 : f32 to vector<8x128xf32>
    %15 = arith.addf %13, %14 : vector<8x128xf32>
    %cst_12 = arith.constant 5.000000e-01 : f32
    %16 = vector.broadcast %cst_12 : f32 to vector<8x128xf32>
    %17 = arith.mulf %16, %15 : vector<8x128xf32>
    %18 = vector.extract_strided_slice %9 {offsets = [0, 128], sizes = [8, 128], strides = [1, 1]} : vector<8x512xf32> to vector<8x128xf32>
    %cst_13 = arith.constant 5.000000e-01 : f32
    %19 = vector.broadcast %cst_13 : f32 to vector<8x128xf32>
    %20 = arith.mulf %19, %18 : vector<8x128xf32>
    %21 = math.tanh %20 : vector<8x128xf32>
    %cst_14 = arith.constant 1.000000e+00 : f32
    %22 = vector.broadcast %cst_14 : f32 to vector<8x128xf32>
    %23 = arith.addf %21, %22 : vector<8x128xf32>
    %cst_15 = arith.constant 5.000000e-01 : f32
    %24 = vector.broadcast %cst_15 : f32 to vector<8x128xf32>
    %25 = arith.mulf %24, %23 : vector<8x128xf32>
    %26 = vector.extract_strided_slice %9 {offsets = [0, 256], sizes = [8, 128], strides = [1, 1]} : vector<8x512xf32> to vector<8x128xf32>
    %27 = math.tanh %26 : vector<8x128xf32>
    %28 = vector.extract_strided_slice %9 {offsets = [0, 384], sizes = [8, 128], strides = [1, 1]} : vector<8x512xf32> to vector<8x128xf32>
    %cst_16 = arith.constant 5.000000e-01 : f32
    %29 = vector.broadcast %cst_16 : f32 to vector<8x128xf32>
    %30 = arith.mulf %29, %28 : vector<8x128xf32>
    %31 = math.tanh %30 : vector<8x128xf32>
    %cst_17 = arith.constant 1.000000e+00 : f32
    %32 = vector.broadcast %cst_17 : f32 to vector<8x128xf32>
    %33 = arith.addf %31, %32 : vector<8x128xf32>
    %cst_18 = arith.constant 5.000000e-01 : f32
    %34 = vector.broadcast %cst_18 : f32 to vector<8x128xf32>
    %35 = arith.mulf %34, %33 : vector<8x128xf32>
    %c0_19 = arith.constant 0 : index
    %c0_20 = arith.constant 0 : index
    %36 = vector.load %arg3[%c0_19, %c0_20] : memref<8x128xf32, #tpu.memory_space<vmem>>, vector<8x128xf32>
    %37 = arith.mulf %25, %36 : vector<8x128xf32>
    %38 = arith.mulf %17, %27 : vector<8x128xf32>
    %39 = arith.addf %37, %38 : vector<8x128xf32>
    %40 = math.tanh %39 : vector<8x128xf32>
    %41 = arith.mulf %35, %40 : vector<8x128xf32>
    %c0_21 = arith.constant 0 : index
    %c0_22 = arith.constant 0 : index
    %42 = vector.load %arg7[%c0_21, %c0_22] : memref<8x128xf32, #tpu.memory_space<vmem>>, vector<8x128xf32>
    tpu.vector_store %arg7[%c0_21, %c0_22], %41 {strides = array<i32>} : memref<8x128xf32, #tpu.memory_space<vmem>>, vector<8x128xf32>,
    %c0_23 = arith.constant 0 : index
    %c0_24 = arith.constant 0 : index
    %43 = vector.load %arg8[%c0_23, %c0_24] : memref<8x128xf32, #tpu.memory_space<vmem>>, vector<8x128xf32>
    tpu.vector_store %arg8[%c0_23, %c0_24], %39 {strides = array<i32>} : memref<8x128xf32, #tpu.memory_space<vmem>>, vector<8x128xf32>,
    return
  }
  func.func @transform_0(%arg0: i32) -> (i32, i32) {
    %c0_i32 = arith.constant 0 : i32
    %c0_i32_0 = arith.constant 0 : i32
    return %arg0, %c0_i32 : i32, i32
  }
  func.func @transform_1(%arg0: i32) -> (i32, i32) {
    %c0_i32 = arith.constant 0 : i32
    %c0_i32_0 = arith.constant 0 : i32
    return %arg0, %c0_i32 : i32, i32
  }
  func.func @transform_2(%arg0: i32) -> (i32, i32) {
    %c0_i32 = arith.constant 0 : i32
    %c0_i32_0 = arith.constant 0 : i32
    return %arg0, %c0_i32 : i32, i32
  }
  func.func @transform_3(%arg0: i32) -> (i32, i32) {
    %c0_i32 = arith.constant 0 : i32
    %c0_i32_0 = arith.constant 0 : i32
    %c0_i32_1 = arith.constant 0 : i32
    return %c0_i32, %c0_i32_0 : i32, i32
  }
  func.func @transform_4(%arg0: i32) -> (i32, i32) {
    %c0_i32 = arith.constant 0 : i32
    %c0_i32_0 = arith.constant 0 : i32
    %c0_i32_1 = arith.constant 0 : i32
    return %c0_i32, %c0_i32_0 : i32, i32
  }
  func.func @transform_5(%arg0: i32) -> (i32, i32) {
    %c0_i32 = arith.constant 0 : i32
    %c0_i32_0 = arith.constant 0 : i32
    %c0_i32_1 = arith.constant 0 : i32
    return %c0_i32, %c0_i32_0 : i32, i32
  }
  func.func @transform_6(%arg0: i32) -> (i32, i32) {
    %c0_i32 = arith.constant 0 : i32
    %c0_i32_0 = arith.constant 0 : i32
    return %arg0, %c0_i32 : i32, i32
  }
  func.func @transform_7(%arg0: i32) -> (i32, i32) {
    %c0_i32 = arith.constant 0 : i32
    %c0_i32_0 = arith.constant 0 : i32
    return %arg0, %c0_i32 : i32, i32
  }
}

</mosaic_0001>

<bundles_post_ra>
// kernel: tpu_custom_call.1
= control target key start
LH: loop header
LB: loop body
LE: loop exit
PB: predicated region body
PF: predicated region fallthrough
CT: control target
= control target key end

     0   :  { %13 = vsyncpa [#allocation3], 0  ;;  %s1264_s0 = inlined_call_operand.hbm [shape: bf16[8,128], index: 0, kind: input, shape index: {}]   ;;  %s1265_s1 = inlined_call_operand.hbm [shape: bf16[8,128], index: 1, kind: input, shape index: {}]   ;;  %s1266_s2 = inlined_call_operand.hbm [shape: f32[8,128], index: 2, kind: input, shape index: {}]   ;;  %s1267_s3 = inlined_call_operand.hbm [shape: bf16[128,512], index: 3, kind: input, shape index: {}]   ;;  %s1268_s4 = inlined_call_operand.hbm [shape: bf16[128,512], index: 4, kind: input, shape index: {}]   ;;  %s1269_s5 = inlined_call_operand.hbm [shape: f32[1,512], index: 5, kind: input, shape index: {}]   ;;  %s1270_s6 = inlined_call_operand.hbm [shape: f32[8,128], index: 6, kind: output, shape index: {0}]   ;;  %s1271_s7 = inlined_call_operand.hbm [shape: f32[8,128], index: 7, kind: output, shape index: {1}]  }
   0x1   :  { %14 = vsyncpa [#allocation6], 0 }
   0x2   :  { %15 = vsyncpa [#allocation9], 0 }
   0x3   :  { %16 = vsyncpa [#allocation12], 0 }
   0x4   :  { %17 = vsyncpa [#allocation4], 0 }
   0x5   :  { %18 = vsyncpa [#allocation15], 0  ;;  %s1100_s24 = smov [#allocation5]   ;;  %s1101_s26 = smov [#allocation8]  }
   0x6   :  { %s35_s25 = sshll.u32 %s1100_s24, 4  ;;  %s54_s27 = sshll.u32 %s1101_s26, 4  ;;  %s36_s25 = int_to_ptr.vmem [resolvable:$true] %s35_s25  ;;  %s1151_s27 = int_to_ptr.vmem [resolvable:$true] %s54_s27 }
   0x7   :  { %s912_s30 = scalar_lea.hbm %s1265_s1, 64 }
   0x8   :  { %p913_p0 = scmp.ne.s32.totalorder %s1265_s1, %s912_s30  ;;  %p916_p1 = scmp.lt.u32.totalorder %s912_s30, %s1265_s1 }
   0xa   :  { %p918_p2 = pnand %p916_p1, %p913_p0 }
   0xc   :  { %921 = shalt.err (!%p918_p2)
}
   0xd   :  { %s922_s12 = scalar_lea.vmem %s36_s25, 64  ;;  %p927_p4 = scmp.lt.s32.totalorder %s36_s25, %s36_s25 }
   0xe   :  { %p923_p3 = scmp.ne.s32.totalorder %s36_s25, %s922_s12  ;;  %p928_p5 = scmp.lt.s32.totalorder %s922_s12, %s922_s12 }
  0x10   :  { %p929_p6 = por %p928_p5, %p927_p4 }
  0x12   :  { %p930_p7 = pnand %p929_p6, %p923_p3 }
  0x14   :  { %933 = shalt.err (!%p930_p7)
}
  0x15   :  { %38 = dma.hbm_to_vmem [thread:$0]  %s1265_s1, 64, %s36_s25, [#allocation6]  }
  0x16   :  { %s934_s17 = scalar_lea.hbm %s1267_s3, 4096 }
  0x17   :  { %p935_p8 = scmp.ne.s32.totalorder %s1267_s3, %s934_s17  ;;  %p938_p9 = scmp.lt.u32.totalorder %s934_s17, %s1267_s3 }
  0x19   :  { %p940_p10 = pnand %p938_p9, %p935_p8 }
  0x1b   :  { %943 = shalt.err (!%p940_p10)
}
  0x1c   :  { %s944_s22 = scalar_lea.vmem %s1151_s27, 4096  ;;  %p949_p12 = scmp.lt.s32.totalorder %s1151_s27, %s1151_s27 }
  0x1d   :  { %p945_p11 = scmp.ne.s32.totalorder %s1151_s27, %s944_s22  ;;  %p950_p13 = scmp.lt.s32.totalorder %s944_s22, %s944_s22 }
  0x1f   :  { %p951_p0 = por %p950_p13, %p949_p12 }
  0x21   :  { %p952_p1 = pnand %p951_p0, %p945_p11 }
  0x23   :  { %955 = shalt.err (!%p952_p1)
}
  0x24   :  { %s1102_s1 = smov 256   ;;  %s1103_s23 = smov 16  }
  0x25   :  { %60 = dma.hbm_to_vmem [thread:$0]  %s1267_s3, 4096, %s1151_s27, [#allocation9], %s1102_s1, %s1102_s1, %s1103_s23  }
  0x26   :  { %s1104_s26 = smov [#allocation2]   ;;  %s1105_s29 = smov [#allocation7]  }
  0x27   :  { %s25_s28 = sshll.u32 %s1104_s26, 4  ;;  %s45_s30 = sshll.u32 %s1105_s29, 4  ;;  %s26_s28 = int_to_ptr.vmem [resolvable:$true] %s25_s28  ;;  %s46_s30 = int_to_ptr.vmem [resolvable:$true] %s45_s30 }
  0x28   :  { %s956_s10 = scalar_lea.hbm %s1264_s0, 64 }
  0x29   :  { %p957_p2 = scmp.ne.s32.totalorder %s1264_s0, %s956_s10  ;;  %p960_p3 = scmp.lt.u32.totalorder %s956_s10, %s1264_s0 }
  0x2b   :  { %p962_p4 = pnand %p960_p3, %p957_p2 }
  0x2d   :  { %965 = shalt.err (!%p962_p4)
}
  0x2e   :  { %s966_s3 = scalar_lea.vmem %s26_s28, 64  ;;  %p971_p6 = scmp.lt.s32.totalorder %s26_s28, %s26_s28 }
  0x2f   :  { %p967_p5 = scmp.ne.s32.totalorder %s26_s28, %s966_s3  ;;  %p972_p7 = scmp.lt.s32.totalorder %s966_s3, %s966_s3 }
  0x31   :  { %p973_p8 = por %p972_p7, %p971_p6 }
  0x33   :  { %p974_p9 = pnand %p973_p8, %p967_p5 }
  0x35   :  { %977 = shalt.err (!%p974_p9)
}
  0x36   :  { %28 = dma.hbm_to_vmem [thread:$0]  %s1264_s0, 64, %s26_s28, [#allocation3]  }
  0x37   :  { %s978_s18 = scalar_lea.hbm %s1266_s2, 128 }
  0x38   :  { %p979_p10 = scmp.ne.s32.totalorder %s1266_s2, %s978_s18  ;;  %p982_p11 = scmp.lt.u32.totalorder %s978_s18, %s1266_s2 }
  0x3a   :  { %p984_p12 = pnand %p982_p11, %p979_p10 }
  0x3c   :  { %987 = shalt.err (!%p984_p12)
}
  0x3d   :  { %s988_s24 = scalar_lea.vmem %s46_s30, 128  ;;  %p993_p0 = scmp.lt.s32.totalorder %s46_s30, %s46_s30 }
  0x3e   :  { %p989_p13 = scmp.ne.s32.totalorder %s46_s30, %s988_s24  ;;  %p994_p1 = scmp.lt.s32.totalorder %s988_s24, %s988_s24 }
  0x40   :  { %p995_p2 = por %p994_p1, %p993_p0 }
  0x42   :  { %p996_p3 = pnand %p995_p2, %p989_p13 }
  0x44   :  { %999 = shalt.err (!%p996_p3)
}
  0x45   :  { %48 = dma.hbm_to_vmem [thread:$0]  %s1266_s2, 128, %s46_s30, [#allocation6]  }
  0x46   :  { %s1106_s26 = smov [#allocation10]   ;;  %s1107_s29 = smov [#allocation11]  }
  0x47   :  { %s66_s28 = sshll.u32 %s1106_s26, 4  ;;  %s79_s8 = sshll.u32 %s1107_s29, 4  ;;  %s67_s28 = int_to_ptr.vmem [resolvable:$true] %s66_s28  ;;  %s80_s8 = int_to_ptr.vmem [resolvable:$true] %s79_s8 }
  0x48   :  { %s1000_s11 = scalar_lea.hbm %s1268_s4, 4096 }
  0x49   :  { %p1001_p4 = scmp.ne.s32.totalorder %s1268_s4, %s1000_s11  ;;  %p1004_p5 = scmp.lt.u32.totalorder %s1000_s11, %s1268_s4 }
  0x4b   :  { %p1006_p6 = pnand %p1004_p5, %p1001_p4 }
  0x4d   :  { %1009 = shalt.err (!%p1006_p6)
}
  0x4e   :  { %s1010_s2 = scalar_lea.vmem %s67_s28, 4096  ;;  %p1015_p8 = scmp.lt.s32.totalorder %s67_s28, %s67_s28 }
  0x4f   :  { %p1011_p7 = scmp.ne.s32.totalorder %s67_s28, %s1010_s2  ;;  %p1016_p9 = scmp.lt.s32.totalorder %s1010_s2, %s1010_s2 }
  0x51   :  { %p1017_p10 = por %p1016_p9, %p1015_p8 }
  0x53   :  { %p1018_p11 = pnand %p1017_p10, %p1011_p7 }
  0x55   :  { %1021 = shalt.err (!%p1018_p11)
}
  0x56   :  { %72 = dma.hbm_to_vmem [thread:$0]  %s1268_s4, 4096, %s67_s28, [#allocation9], %s1102_s1, %s1102_s1, %s1103_s23  }
  0x57   :  { %s1022_s17 = scalar_lea.hbm %s1269_s5, 64 }
  0x58   :  { %p1023_p12 = scmp.ne.s32.totalorder %s1269_s5, %s1022_s17  ;;  %p1026_p13 = scmp.lt.u32.totalorder %s1022_s17, %s1269_s5 }
  0x5a   :  { %p1028_p0 = pnand %p1026_p13, %p1023_p12 }
  0x5c   :  { %1031 = shalt.err (!%p1028_p0)
}
  0x5d   :  { %s1032_s22 = scalar_lea.vmem %s80_s8, 64  ;;  %p1037_p2 = scmp.lt.s32.totalorder %s80_s8, %s80_s8 }
  0x5e   :  { %p1033_p1 = scmp.ne.s32.totalorder %s80_s8, %s1032_s22  ;;  %p1038_p3 = scmp.lt.s32.totalorder %s1032_s22, %s1032_s22 }
  0x60   :  { %p1039_p4 = por %p1038_p3, %p1037_p2 }
  0x62   :  { %p1040_p5 = pnand %p1039_p4, %p1033_p1 }
  0x64   :  { %1043 = shalt.err (!%p1040_p5)
}
  0x65   :  { %82 = dma.hbm_to_vmem [thread:$0]  %s1269_s5, 64, %s80_s8, [#allocation12]  }
  0x66   :  { %1088 = dma.done.wait [#allocation3], 64  }
  0x67   :  { %1089 = vsyncadd [#allocation3], 4294967232 }
  0x68   :  { %1090 = dma.done.wait [#allocation6], 192  }
  0x69   :  { %1091 = vsyncadd [#allocation6], 4294967104 }
  0x6a   :  { %1092 = dma.done.wait [#allocation9], 8192  }
  0x6b   :  { %1093 = vsyncadd [#allocation9], 4294959104 }
  0x6c   :  { %1094 = dma.done.wait [#allocation12], 64  }
  0x6d   :  { %1095 = vsyncadd [#allocation12], 4294967232  ;;  %v1108_v0 = vmov 0   ;;  %v806_v1 = vld [vmem:[#allocation10 + $0x4] ss:$16 sps:$4 sm:$0xff]   ;;  %s1109_s5 = smov [#allocation14]  }
  0x6e   :  { %360 = vmatprep.mubr.bf16.mxu0 %v1108_v0  ;;  %401 = vmatprep.mubr.bf16.mxu1 %v1108_v0  ;;  %v808_v2 = vld [vmem:[#allocation10 + $0xc] ss:$16 sps:$4 sm:$0xff]   ;;  %v810_v3 = vld [vmem:[#allocation10] ss:$16 sps:$4 sm:$0xff]   ;;  %v811_v4 = vld [vmem:[#allocation10 + $0x8] ss:$16 sps:$4 sm:$0xff]  }
  0x6f   :  { %328 = vmatprep.subr.bf16.mxu0 %v806_v1  ;;  %369 = vmatprep.subr.bf16.mxu1 %v808_v2  ;;  %v812_v5 = vld [vmem:[#allocation10 + $0x24] ss:$16 sps:$4 sm:$0xff]   ;;  %v814_v6 = vld [vmem:[#allocation10 + $0x2c] ss:$16 sps:$4 sm:$0xff]   ;;  %v816_v7 = vld [vmem:[#allocation10 + $0x20] ss:$16 sps:$4 sm:$0xff]  }
  0x70   :  { %329 = vmatpush1.bf16.msra.mxu0 %v810_v3  ;;  %370 = vmatpush1.bf16.msra.mxu1 %v811_v4  ;;  %v817_v8 = vld [vmem:[#allocation10 + $0x28] ss:$16 sps:$4 sm:$0xff]   ;;  %v818_v9 = vld [vmem:[#allocation10 + $0x44] ss:$16 sps:$4 sm:$0xff]   ;;  %v820_v10 = vld [vmem:[#allocation10 + $0x4c] ss:$16 sps:$4 sm:$0xff]  }
  0x71   :  { %330 = vmatprep.subr.bf16.mxu0 %v812_v5  ;;  %371 = vmatprep.subr.bf16.mxu1 %v814_v6  ;;  %v822_v11 = vld [vmem:[#allocation10 + $0x40] ss:$16 sps:$4 sm:$0xff]   ;;  %v823_v12 = vld [vmem:[#allocation10 + $0x48] ss:$16 sps:$4 sm:$0xff]   ;;  %v824_v13 = vld [vmem:[#allocation10 + $0x64] ss:$16 sps:$4 sm:$0xff]  }
  0x72   :  { %v826_v14 = vld [vmem:[#allocation10 + $0x6c] ss:$16 sps:$4 sm:$0xff]   ;;  %v828_v15 = vld [vmem:[#allocation10 + $0x60] ss:$16 sps:$4 sm:$0xff]   ;;  %v829_v16 = vld [vmem:[#allocation10 + $0x68] ss:$16 sps:$4 sm:$0xff]  }
  0x73   :  { %v830_v17 = vld [vmem:[#allocation10 + $0x84] ss:$16 sps:$4 sm:$0xff]   ;;  %v832_v18 = vld [vmem:[#allocation10 + $0x8c] ss:$16 sps:$4 sm:$0xff]   ;;  %v834_v19 = vld [vmem:[#allocation10 + $0x80] ss:$16 sps:$4 sm:$0xff]  }
  0x74   :  { %331 = vmatpush1.bf16.msra.mxu0 %v816_v7  ;;  %372 = vmatpush1.bf16.msra.mxu1 %v817_v8  ;;  %v835_v20 = vld [vmem:[#allocation10 + $0x88] ss:$16 sps:$4 sm:$0xff]   ;;  %v836_v21 = vld [vmem:[#allocation10 + $0xa4] ss:$16 sps:$4 sm:$0xff]   ;;  %v838_v22 = vld [vmem:[#allocation10 + $0xac] ss:$16 sps:$4 sm:$0xff]  }
  0x75   :  { %332 = vmatprep.subr.bf16.mxu0 %v818_v9  ;;  %373 = vmatprep.subr.bf16.mxu1 %v820_v10  ;;  %v840_v23 = vld [vmem:[#allocation10 + $0xa0] ss:$16 sps:$4 sm:$0xff]   ;;  %v841_v24 = vld [vmem:[#allocation10 + $0xa8] ss:$16 sps:$4 sm:$0xff]   ;;  %v842_v25 = vld [vmem:[#allocation10 + $0xc4] ss:$16 sps:$4 sm:$0xff]  }
  0x76   :  { %v844_v26 = vld [vmem:[#allocation10 + $0xcc] ss:$16 sps:$4 sm:$0xff]   ;;  %v846_v27 = vld [vmem:[#allocation10 + $0xc0] ss:$16 sps:$4 sm:$0xff]   ;;  %v847_v28 = vld [vmem:[#allocation10 + $0xc8] ss:$16 sps:$4 sm:$0xff]  }
  0x77   :  { %v848_v29 = vld [vmem:[#allocation10 + $0xe4] ss:$16 sps:$4 sm:$0xff]   ;;  %v850_v30 = vld [vmem:[#allocation10 + $0xec] ss:$16 sps:$4 sm:$0xff]   ;;  %v852_v31 = vld [vmem:[#allocation10 + $0xe0] ss:$16 sps:$4 sm:$0xff]  }
  0x78   :  { %333 = vmatpush1.bf16.msra.mxu0 %v822_v11  ;;  %374 = vmatpush1.bf16.msra.mxu1 %v823_v12  ;;  %v853_v32 = vld [vmem:[#allocation10 + $0xe8] ss:$16 sps:$4 sm:$0xff]   ;;  %v856_v33 = vld [vmem:[#allocation8 + $0x4] ss:$16 sps:$4 sm:$0xff]   ;;  %v859_v34 = vld [vmem:[#allocation8 + $0xc] ss:$16 sps:$4 sm:$0xff]   ;;  %v654_v11 = vlaneseq }
  0x79   :  { %334 = vmatprep.subr.bf16.mxu0 %v824_v13  ;;  %375 = vmatprep.subr.bf16.mxu1 %v826_v14  ;;  %v135_v35 = vld [vmem:[#allocation5] sm:$0xf]  ;;  %v854_v36 = vld [vmem:[#allocation8] ss:$16 sps:$4 sm:$0xff]   ;;  %v857_v37 = vld [vmem:[#allocation8 + $0x8] ss:$16 sps:$4 sm:$0xff]  }
  0x7a   :  { %v862_v38 = vld [vmem:[#allocation8 + $0x24] ss:$16 sps:$4 sm:$0xff]   ;;  %v865_v39 = vld [vmem:[#allocation8 + $0x2c] ss:$16 sps:$4 sm:$0xff]   ;;  %v860_v40 = vld [vmem:[#allocation8 + $0x20] ss:$16 sps:$4 sm:$0xff]  }
  0x7b   :  { %v863_v41 = vld [vmem:[#allocation8 + $0x28] ss:$16 sps:$4 sm:$0xff]   ;;  %v868_v42 = vld [vmem:[#allocation8 + $0x44] ss:$16 sps:$4 sm:$0xff]   ;;  %v871_v43 = vld [vmem:[#allocation8 + $0x4c] ss:$16 sps:$4 sm:$0xff]  }
  0x7c   :  { %335 = vmatpush1.bf16.msra.mxu0 %v828_v15  ;;  %376 = vmatpush1.bf16.msra.mxu1 %v829_v16  ;;  %v866_v44 = vld [vmem:[#allocation8 + $0x40] ss:$16 sps:$4 sm:$0xff]   ;;  %v869_v45 = vld [vmem:[#allocation8 + $0x48] ss:$16 sps:$4 sm:$0xff]   ;;  %v874_v46 = vld [vmem:[#allocation8 + $0x64] ss:$16 sps:$4 sm:$0xff]  }
  0x7d   :  { %336 = vmatprep.subr.bf16.mxu0 %v830_v17  ;;  %377 = vmatprep.subr.bf16.mxu1 %v832_v18  ;;  %v877_v47 = vld [vmem:[#allocation8 + $0x6c] ss:$16 sps:$4 sm:$0xff]   ;;  %v872_v48 = vld [vmem:[#allocation8 + $0x60] ss:$16 sps:$4 sm:$0xff]   ;;  %v875_v49 = vld [vmem:[#allocation8 + $0x68] ss:$16 sps:$4 sm:$0xff]  }
  0x7e   :  { %v880_v50 = vld [vmem:[#allocation8 + $0x84] ss:$16 sps:$4 sm:$0xff]   ;;  %v883_v51 = vld [vmem:[#allocation8 + $0x8c] ss:$16 sps:$4 sm:$0xff]   ;;  %v878_v52 = vld [vmem:[#allocation8 + $0x80] ss:$16 sps:$4 sm:$0xff]  }
  0x7f   :  { %v881_v53 = vld [vmem:[#allocation8 + $0x88] ss:$16 sps:$4 sm:$0xff]   ;;  %v886_v54 = vld [vmem:[#allocation8 + $0xa4] ss:$16 sps:$4 sm:$0xff]   ;;  %v889_v55 = vld [vmem:[#allocation8 + $0xac] ss:$16 sps:$4 sm:$0xff]  }
  0x80   :  { %337 = vmatpush1.bf16.msra.mxu0 %v834_v19  ;;  %378 = vmatpush1.bf16.msra.mxu1 %v835_v20  ;;  %v884_v56 = vld [vmem:[#allocation8 + $0xa0] ss:$16 sps:$4 sm:$0xff]   ;;  %v887_v57 = vld [vmem:[#allocation8 + $0xa8] ss:$16 sps:$4 sm:$0xff]   ;;  %v892_v58 = vld [vmem:[#allocation8 + $0xc4] ss:$16 sps:$4 sm:$0xff]  }
  0x81   :  { %338 = vmatprep.subr.bf16.mxu0 %v836_v21  ;;  %379 = vmatprep.subr.bf16.mxu1 %v838_v22  ;;  %v895_v59 = vld [vmem:[#allocation8 + $0xcc] ss:$16 sps:$4 sm:$0xff]   ;;  %v890_v60 = vld [vmem:[#allocation8 + $0xc0] ss:$16 sps:$4 sm:$0xff]   ;;  %v893_v61 = vld [vmem:[#allocation8 + $0xc8] ss:$16 sps:$4 sm:$0xff]  }
  0x82   :  { %v898_v62 = vld [vmem:[#allocation8 + $0xe4] ss:$16 sps:$4 sm:$0xff]   ;;  %v901_v63 = vld [vmem:[#allocation8 + $0xec] ss:$16 sps:$4 sm:$0xff]   ;;  %v899_v1 = vld [vmem:[#allocation8 + $0xe8] ss:$16 sps:$4 sm:$0xff]  }
  0x83   :  { %v102_v2 = vld [vmem:[#allocation2] sm:$0xf]  ;;  %v655_v12 = vshrl.u32 %v654_v11, 7  ;;  %v652_v14 = vld [vmem:[#allocation11] sm:$0xf]  ;;  %s715_s23 = sshll.u32 %s1109_s5, 4  ;;  %s716_s23 = int_to_ptr.vmem [resolvable:$true] %s715_s23 }
  0x84   :  { %339 = vmatpush1.bf16.msra.mxu0 %v840_v23  ;;  %380 = vmatpush1.bf16.msra.mxu1 %v841_v24  ;;  %s1044_s24 = scalar_lea.vmem %s716_s23, 128  ;;  %p1049_p7 = scmp.lt.s32.totalorder %s716_s23, %s716_s23 }
  0x85   :  { %340 = vmatprep.subr.bf16.mxu0 %v842_v25  ;;  %381 = vmatprep.subr.bf16.mxu1 %v844_v26  ;;  %v656_v13 = vsub.s32 0, %v655_v12  ;;  %v660_v15 = vsub.s32 1, %v655_v12  ;;  %v664_v17 = vsub.s32 2, %v655_v12  ;;  %p1045_p6 = scmp.ne.s32.totalorder %s716_s23, %s1044_s24  ;;  %p1050_p8 = scmp.lt.s32.totalorder %s1044_s24, %s1044_s24 }
  0x87   :  { %v657_v16 = vrot.slane %v652_v14, %v656_v13  ;;  %v661_v20 = vrot.slane %v652_v14, %v660_v15  ;;  %p1051_p9 = por %p1050_p8, %p1049_p7 }
  0x88   :  { %341 = vmatpush1.bf16.msra.mxu0 %v846_v27  ;;  %382 = vmatpush1.bf16.msra.mxu1 %v847_v28 }
  0x89   :  { %342 = vmatprep.subr.bf16.mxu0 %v848_v29  ;;  %383 = vmatprep.subr.bf16.mxu1 %v850_v30  ;;  %v665_v30 = vrot.slane %v652_v14, %v664_v17  ;;  %p1052_p10 = pnand %p1051_p9, %p1045_p6 }
  0x8c   :  { %343 = vmatpush1.bf16.msra.mxu0 %v852_v31  ;;  %384 = vmatpush1.bf16.msra.mxu1 %v853_v32  ;;  %v668_v31 = vsub.s32 3, %v655_v12 }
  0x8d   :  { %570 = vmatprep.subr.bf16.mxu0 %v856_v33  ;;  %611 = vmatprep.subr.bf16.mxu1 %v859_v34 }
  0x8f   :  { %361 = vmatmul.mubr.bf16.vlgmr.msra.gmra.mrb[0].mxu0 %v135_v35  ;;  %402 = vmatmul.mubr.bf16.vlgmr.msra.gmra.mrb[0].mxu1 %v135_v35 }
  0x90   :  { %571 = vmatpush1.bf16.msra.mxu0 %v854_v36  ;;  %612 = vmatpush1.bf16.msra.mxu1 %v857_v37 }
  0x91   :  { %572 = vmatprep.subr.bf16.mxu0 %v862_v38  ;;  %613 = vmatprep.subr.bf16.mxu1 %v865_v39  ;;  %v669_v38 = vrot.slane %v652_v14, %v668_v31 }
  0x92   :  { %602 = vmatprep.mubr.bf16.mxu0 %v1108_v0  ;;  %643 = vmatprep.mubr.bf16.mxu1 %v1108_v0  ;;  %v896_v0 = vld [vmem:[#allocation8 + $0xe0] ss:$16 sps:$4 sm:$0xff]  }
  0x94   :  { %573 = vmatpush1.bf16.msra.mxu0 %v860_v40  ;;  %614 = vmatpush1.bf16.msra.mxu1 %v863_v41 }
  0x95   :  { %574 = vmatprep.subr.bf16.mxu0 %v868_v42  ;;  %615 = vmatprep.subr.bf16.mxu1 %v871_v43 }
  0x98   :  { %575 = vmatpush1.bf16.msra.mxu0 %v866_v44  ;;  %616 = vmatpush1.bf16.msra.mxu1 %v869_v45 }
  0x99   :  { %576 = vmatprep.subr.bf16.mxu0 %v874_v46  ;;  %617 = vmatprep.subr.bf16.mxu1 %v877_v47  ;;  %v691_v46 = vld [vmem:[#allocation7] sm:$0xff] }
  0x9c   :  { %577 = vmatpush1.bf16.msra.mxu0 %v872_v48  ;;  %618 = vmatpush1.bf16.msra.mxu1 %v875_v49 }
  0x9d   :  { %578 = vmatprep.subr.bf16.mxu0 %v880_v50  ;;  %619 = vmatprep.subr.bf16.mxu1 %v883_v51 }
  0xa0   :  { %579 = vmatpush1.bf16.msra.mxu0 %v878_v52  ;;  %620 = vmatpush1.bf16.msra.mxu1 %v881_v53 }
  0xa1   :  { %580 = vmatprep.subr.bf16.mxu0 %v886_v54  ;;  %621 = vmatprep.subr.bf16.mxu1 %v889_v55 }
  0xa4   :  { %581 = vmatpush1.bf16.msra.mxu0 %v884_v56  ;;  %622 = vmatpush1.bf16.msra.mxu1 %v887_v57 }
  0xa5   :  { %582 = vmatprep.subr.bf16.mxu0 %v892_v58  ;;  %623 = vmatprep.subr.bf16.mxu1 %v895_v59 }
  0xa8   :  { %583 = vmatpush1.bf16.msra.mxu0 %v890_v60  ;;  %624 = vmatpush1.bf16.msra.mxu1 %v893_v61 }
  0xa9   :  { %584 = vmatprep.subr.bf16.mxu0 %v898_v62  ;;  %625 = vmatprep.subr.bf16.mxu1 %v901_v63 }
  0xac   :  { %585 = vmatpush1.bf16.msra.mxu0 %v896_v0  ;;  %626 = vmatpush1.bf16.msra.mxu1 %v899_v1 }
  0xaf   :  { %603 = vmatmul.mubr.bf16.vlgmr.msra.gmra.mrb[4].mxu0 %v102_v2  ;;  %644 = vmatmul.mubr.bf16.vlgmr.msra.gmra.mrb[4].mxu1 %v102_v2 }
 0x162   :  { %v362_v3 = vpop.f32.mrb[0].mxu0  ;;  %v403_v4 = vpop.f32.mrb[0].mxu1 }
 0x163   :  { %v364_v5 = vpop.f32.mrb[1].mxu0  ;;  %v405_v6 = vpop.f32.mrb[1].mxu1 }
 0x164   :  { %v366_v7 = vpop.f32.mrb[2].mxu0  ;;  %v407_v8 = vpop.f32.mrb[2].mxu1 }
 0x165   :  { %v367_v9 = vpop.f32.mrb[3].mxu0  ;;  %v408_v10 = vpop.f32.mrb[3].mxu1 }
 0x182   :  { %v604_v18 = vpop.f32.mrb[4].mxu0  ;;  %v645_v19 = vpop.f32.mrb[4].mxu1 }
 0x183   :  { %v605_v21 = vadd.f32 %v604_v18, %v362_v3  ;;  %v646_v22 = vadd.f32 %v645_v19, %v403_v4  ;;  %v606_v23 = vpop.f32.mrb[5].mxu0  ;;  %v647_v24 = vpop.f32.mrb[5].mxu1 }
 0x184   :  { %v607_v25 = vadd.f32 %v606_v23, %v364_v5  ;;  %v648_v26 = vadd.f32 %v647_v24, %v405_v6  ;;  %v608_v27 = vpop.f32.mrb[6].mxu0  ;;  %v649_v28 = vpop.f32.mrb[6].mxu1 }
 0x185   :  { %v674_v29 = vadd.f32 %v657_v16, %v605_v21  ;;  %v609_v32 = vpop.f32.mrb[7].mxu0  ;;  %v650_v33 = vpop.f32.mrb[7].mxu1  ;;  %v676_v37 = vadd.f32 %v665_v30, %v646_v22 }
 0x186   :  { %v675_v34 = vadd.f32 %v661_v20, %v607_v25  ;;  %v677_v39 = vadd.f32 %v669_v38, %v648_v26 }
 0x187   :  { %v678_v35 = vmul.f32 0.5, %v674_v29 }
 0x188   :  { %v682_v36 = vmul.f32 0.5, %v675_v34  ;;  %v687_v40 = vmul.f32 0.5, %v677_v39 }
 0x189   :  { %902 = vtanh.f32 %v678_v35 }
 0x18a   :  { %904 = vtanh.f32 %v682_v36 }
 0x18b   :  { %906 = vtanh.f32 %v676_v37 }
 0x18c   :  { %908 = vtanh.f32 %v687_v40 }
 0x193   :  { %v903_v41 = vpop.eup %902 }
 0x194   :  { %v905_v42 = vpop.eup %904  ;;  %v680_v43 = vadd.f32 1.0, %v903_v41 }
 0x195   :  { %v684_v44 = vadd.f32 1.0, %v905_v42  ;;  %v907_v47 = vpop.eup %906 }
 0x196   :  { %v681_v45 = vmul.f32 0.5, %v680_v43 }
 0x197   :  { %v685_v48 = vmul.f32 0.5, %v684_v44 }
 0x198   :  { %v693_v49 = vmul.f32 %v907_v47, %v681_v45 }
 0x199   :  { %v692_v50 = vmul.f32 %v691_v46, %v685_v48 }
 0x19b   :  { %v694_v51 = vadd.f32 %v693_v49, %v692_v50 }
 0x19d   :  { %910 = vtanh.f32 %v694_v51  ;;  %698 = vst [vmem:[#allocation14] sm:$0xff] %v694_v51 }
 0x19e   :  { %1055 = shalt.err (!%p1052_p10)
}
 0x19f   :  { %s1056_s26 = scalar_lea.hbm %s1271_s7, 128 }
 0x1a0   :  { %p1057_p11 = scmp.ne.s32.totalorder %s1271_s7, %s1056_s26  ;;  %p1060_p12 = scmp.lt.u32.totalorder %s1056_s26, %s1271_s7 }
 0x1a2   :  { %p1062_p13 = pnand %p1060_p12, %p1057_p11 }
 0x1a4   :  { %1065 = shalt.err (!%p1062_p13)
}
 0x1a5   :  { %718 = dma.vmem_to_hbm [thread:$0]  %s716_s23, 128, %s1271_s7, [#allocation15]   ;;  %v909_v52 = vpop.eup %908 }
 0x1a6   :  { %v689_v53 = vadd.f32 1.0, %v909_v52  ;;  %s1110_s12 = smov [#allocation13]  }
 0x1a7   :  { %s705_s13 = sshll.u32 %s1110_s12, 4  ;;  %v911_v55 = vpop.eup %910  ;;  %s706_s13 = int_to_ptr.vmem [resolvable:$true] %s705_s13 }
 0x1a8   :  { %v690_v54 = vmul.f32 0.5, %v689_v53  ;;  %s1066_s14 = scalar_lea.vmem %s706_s13, 128  ;;  %p1071_p1 = scmp.lt.s32.totalorder %s706_s13, %s706_s13 }
 0x1a9   :  { %p1067_p0 = scmp.ne.s32.totalorder %s706_s13, %s1066_s14  ;;  %p1072_p2 = scmp.lt.s32.totalorder %s1066_s14, %s1066_s14 }
 0x1aa   :  { %v696_v56 = vmul.f32 %v911_v55, %v690_v54 }
 0x1ab   :  { %p1073_p3 = por %p1072_p2, %p1071_p1 }
 0x1ac   :  { %697 = vst [vmem:[#allocation13] sm:$0xff] %v696_v56 }
 0x1ad   :  { %p1074_p4 = pnand %p1073_p3, %p1067_p0 }
 0x1af   :  { %1077 = shalt.err (!%p1074_p4)
}
 0x1b0   :  { %s1078_s7 = scalar_lea.hbm %s1270_s6, 128 }
 0x1b1   :  { %p1079_p5 = scmp.ne.s32.totalorder %s1270_s6, %s1078_s7  ;;  %p1082_p6 = scmp.lt.u32.totalorder %s1078_s7, %s1270_s6 }
 0x1b3   :  { %p1084_p7 = pnand %p1082_p6, %p1079_p5 }
 0x1b5   :  { %1087 = shalt.err (!%p1084_p7)
}
 0x1b6   :  { %708 = dma.vmem_to_hbm [thread:$0]  %s706_s13, 128, %s1270_s6, [#allocation4]  }
 0x1b7   :  { %1096 = dma.done.wait [#allocation4], 128  }
 0x1b8   :  { %1097 = vsyncadd [#allocation4], 4294967168 }
 0x1b9   :  { %1098 = dma.done.wait [#allocation15], 128  }
 0x1ba   :  { %1099 = vsyncadd [#allocation15], 4294967168 }
 0x1bb   :  { %725 = vsyncpa [#allocation3], 1 }
 0x1bc   :  { %726 = vsyncpa [#allocation6], 1 }
 0x1bd   :  { %727 = vsyncpa [#allocation9], 1 }
 0x1be   :  { %728 = vsyncpa [#allocation12], 1 }
 0x1bf   :  { %729 = vsyncpa [#allocation4], 1 }
 0x1c0   :  { %730 = vsyncpa [#allocation15], 1 }

</bundles_post_ra>
